<compile_context>
chip_gen: v5e
topology: v5e:2x2
jax: 0.10.0
libtpu: 0.0.40
codegen_flags: <defaults>
</compile_context>

<pallas_src>
import functools

import jax
import jax.numpy as jnp
from jax.experimental import pallas as pl
from jax.experimental.pallas import tpu as pltpu


HIDDEN = 64
DEFAULT_TILE_B = 8192  # rows per grid step; at D=32 f32 this is 1 MiB per input DMA


def _round_up(x: int, m: int) -> int:
    return ((x + m - 1) // m) * m


def mlp_kernel(u_ref, v_ref, w1u_ref, w1v_ref, b1_ref, w2_ref, b2_ref, o_ref):
    # u, v      : (TB, D)    f32
    # w1u, w1v  : (D, H)     f32
    # b1, w2    : (1, H)     f32
    # b2        : (1, 1)     f32 (SMEM scalar)
    # o         : (1, 1, TB) f32 (lane-dense output block)
    h = jnp.dot(u_ref[...], w1u_ref[...], preferred_element_type=jnp.float32)
    h = h + jnp.dot(v_ref[...], w1v_ref[...], preferred_element_type=jnp.float32)
    h = jnp.maximum(h + b1_ref[...], 0.0)                       # relu, f32

    # fc2 (H -> 1): VPU multiply + lane reduction instead of an N=1 matmul.
    # The sublane->lane relayout for the (1,1,TB) store is XLU work hidden
    # under the input DMA while this kernel stays HBM-bound.
    z = jnp.sum(h * w2_ref[...], axis=-1) + b2_ref[0, 0]        # (TB,)
    o_ref[...] = jax.nn.sigmoid(z).reshape(1, 1, -1)


@functools.partial(jax.jit, static_argnames=("tile_b",))
def recommender_forward(params, user_indices, item_indices, tile_b=DEFAULT_TILE_B):
    B = user_indices.shape[0]
    D = params["user_emb"].shape[1]

    # Tile sizing: multiple of 128 lanes; keep >= 2 tiles for large B so the
    # "parallel" grid axis can shard across v7x's two TensorCores.
    half = (B + 1) // 2
    tile_b = max(128, min(tile_b, _round_up(half, 128)))
    b_pad = _round_up(B, tile_b)
    num_tiles = b_pad // tile_b

    # Pad the O(B) int32 indices, NOT the O(B*D) gathered activations; padded
    # entries gather row 0 (valid data), flow through, and are sliced off.
    if b_pad != B:
        user_indices = jnp.pad(user_indices, (0, b_pad - B))
        item_indices = jnp.pad(item_indices, (0, b_pad - B))

    # Embedding gathers stay in XLA; the concat round trip is removed via the
    # split-W1 trick inside the kernel.
    # TODO(synk): fuse the row gather into the kernel (scalar-prefetched indices
    # + deep per-row DMA pipeline into a (TB, 2D) VMEM buffer); at D=32 each row
    # is only 128 B so this is DMA-descriptor-bound and must be benchmarked
    # against the XLA gather before committing.
    u = jnp.take(params["user_emb"], user_indices, axis=0)      # (b_pad, D) f32
    v = jnp.take(params["item_emb"], item_indices, axis=0)      # (b_pad, D) f32

    out = pl.pallas_call(
        mlp_kernel,
        out_shape=jax.ShapeDtypeStruct((num_tiles, 1, tile_b), jnp.float32),
        grid=(num_tiles,),
        in_specs=[
            pl.BlockSpec((tile_b, D), lambda i: (i, 0)),        # u tile
            pl.BlockSpec((tile_b, D), lambda i: (i, 0)),        # v tile
            pl.BlockSpec((D, HIDDEN), lambda i: (0, 0)),        # w1u (resident)
            pl.BlockSpec((D, HIDDEN), lambda i: (0, 0)),        # w1v (resident)
            pl.BlockSpec((1, HIDDEN), lambda i: (0, 0)),        # b1  (resident)
            pl.BlockSpec((1, HIDDEN), lambda i: (0, 0)),        # w2 row (resident)
            pl.BlockSpec((1, 1), lambda i: (0, 0),
                         memory_space=pltpu.MemorySpace.SMEM),  # b2 scalar
        ],
        out_specs=pl.BlockSpec((1, 1, tile_b), lambda i: (i, 0, 0)),
        compiler_params=pltpu.CompilerParams(
            dimension_semantics=("parallel",),
            # Explicit limit so big tiles never hit v5e's ~16 MiB default scoped
            # VMEM; actual use (2 inputs x 2 bufs x 1 MiB + 2 MiB h) is ~8 MiB.
            vmem_limit_bytes=32 * 1024 * 1024,
        ),
    )(u, v, params["w1u"], params["w1v"], params["b1"], params["w2"], params["b2"])

    return out.reshape(b_pad)[:B]                               # matches .squeeze()


def init_params(key, num_users, num_items, embedding_dim):
    k = jax.random.split(key, 7)
    d, h = embedding_dim, HIDDEN
    scale1 = 1.0 / jnp.sqrt(2.0 * d)
    return {
        # f32 everywhere to match the PyTorch module's numerics.
        "user_emb": jax.random.normal(k[0], (num_users, d), jnp.float32),
        "item_emb": jax.random.normal(k[1], (num_items, d), jnp.float32),
        # W1 stored pre-transposed ([in, out]) and split into the user / item
        # halves of the concat: h = u @ w1u + v @ w1v + b1.
        "w1u": jax.random.normal(k[2], (d, h), jnp.float32) * scale1,
        "w1v": jax.random.normal(k[3], (d, h), jnp.float32) * scale1,
        "b1": jax.random.normal(k[4], (1, h), jnp.float32) * 0.01,
        # W2 stored as a (1, H) row (used as a VPU reduce, not a matmul).
        "w2": jax.random.normal(k[5], (1, h), jnp.float32) * (1.0 / jnp.sqrt(h)),
        "b2": jax.random.normal(k[6], (1, 1), jnp.float32) * 0.01,
    }


if __name__ == "__main__":
    embedding_dim = 32
    num_users = 16
    num_items = 24
    batch = 8

    key = jax.random.PRNGKey(0)
    pkey, ukey, ikey = jax.random.split(key, 3)
    params = init_params(pkey, num_users, num_items, embedding_dim)

    user_indices = jax.random.randint(ukey, (batch,), 0, num_users, dtype=jnp.int32)
    item_indices = jax.random.randint(ikey, (batch,), 0, num_items, dtype=jnp.int32)

    out = recommender_forward(params, user_indices, item_indices)
    out = jax.block_until_ready(out)

    # sanity: shape (B,), values in (0, 1) from the sigmoid
    assert out.shape == (batch,), out.shape
    assert bool(jnp.all((out > 0.0) & (out < 1.0)))

    # reference in plain JAX f32; tolerance covers MXU f32-via-bf16-pass precision
    uv = params["user_emb"][user_indices]
    iv = params["item_emb"][item_indices]
    hr = jnp.maximum(uv @ params["w1u"] + iv @ params["w1v"] + params["b1"], 0.0)
    ref = jax.nn.sigmoid(jnp.sum(hr * params["w2"], axis=-1) + params["b2"][0, 0])
    assert bool(jnp.allclose(out, ref, atol=2e-3, rtol=2e-3)), (out, ref)

    print("KERNEL_OK")
</pallas_src>

<mosaic_0001>
module attributes {stable_mosaic.version = 11 : i64} {
  func.func @mlp_kernel(%arg0: i32, %arg1: memref<128x32xf32, #tpu.memory_space<vmem>>, %arg2: memref<128x32xf32, #tpu.memory_space<vmem>>, %arg3: memref<32x64xf32, #tpu.memory_space<vmem>>, %arg4: memref<32x64xf32, #tpu.memory_space<vmem>>, %arg5: memref<1x64xf32, #tpu.memory_space<vmem>>, %arg6: memref<1x64xf32, #tpu.memory_space<vmem>>, %arg7: memref<1x1xf32, #tpu.memory_space<smem>>, %arg8: memref<1x1x128xf32, #tpu.memory_space<vmem>>) attributes {dimension_semantics = [#tpu.dimension_semantics<parallel>], iteration_bounds = array<i64: 1>, scalar_prefetch = 0 : i64, scratch_operands = 0 : i64, tpu.core_type = #tpu.core_type<tc>, window_params = [{transform_indices = @transform_0, window_bounds = array<i64: 128, 32>}, {transform_indices = @transform_1, window_bounds = array<i64: 128, 32>}, {pipeline_mode = #tpu.pipeline_mode<synchronous>, transform_indices = @transform_2, window_bounds = array<i64: 32, 64>}, {pipeline_mode = #tpu.pipeline_mode<synchronous>, transform_indices = @transform_3, window_bounds = array<i64: 32, 64>}, {pipeline_mode = #tpu.pipeline_mode<synchronous>, transform_indices = @transform_4, window_bounds = array<i64: 1, 64>}, {pipeline_mode = #tpu.pipeline_mode<synchronous>, transform_indices = @transform_5, window_bounds = array<i64: 1, 64>}, {transform_indices = @transform_6, window_bounds = array<i64: 1, 1>}, {transform_indices = @transform_7, window_bounds = array<i64: 1, 1, 128>}]} {
    %c0 = arith.constant 0 : index
    %c0_0 = arith.constant 0 : index
    %0 = vector.load %arg1[%c0, %c0_0] : memref<128x32xf32, #tpu.memory_space<vmem>>, vector<128x32xf32>
    %c0_1 = arith.constant 0 : index
    %c0_2 = arith.constant 0 : index
    %1 = vector.load %arg3[%c0_1, %c0_2] : memref<32x64xf32, #tpu.memory_space<vmem>>, vector<32x64xf32>
    %cst = arith.constant dense<0.000000e+00> : vector<128x64xf32>
    %2 = tpu.matmul %0, %1, %cst {dimension_numbers = #tpu.dot_dimension_numbers<[1], [0], [0], [1], [0, 0, 1, 1], [], []>} : vector<128x32xf32>, vector<32x64xf32>, vector<128x64xf32> -> vector<128x64xf32>
    %c0_3 = arith.constant 0 : index
    %c0_4 = arith.constant 0 : index
    %3 = vector.load %arg2[%c0_3, %c0_4] : memref<128x32xf32, #tpu.memory_space<vmem>>, vector<128x32xf32>
    %c0_5 = arith.constant 0 : index
    %c0_6 = arith.constant 0 : index
    %4 = vector.load %arg4[%c0_5, %c0_6] : memref<32x64xf32, #tpu.memory_space<vmem>>, vector<32x64xf32>
    %cst_7 = arith.constant dense<0.000000e+00> : vector<128x64xf32>
    %5 = tpu.matmul %3, %4, %cst_7 {dimension_numbers = #tpu.dot_dimension_numbers<[1], [0], [0], [1], [0, 0, 1, 1], [], []>} : vector<128x32xf32>, vector<32x64xf32>, vector<128x64xf32> -> vector<128x64xf32>
    %6 = arith.addf %2, %5 : vector<128x64xf32>
    %c0_8 = arith.constant 0 : index
    %c0_9 = arith.constant 0 : index
    %7 = vector.load %arg5[%c0_8, %c0_9] : memref<1x64xf32, #tpu.memory_space<vmem>>, vector<1x64xf32>
    %8 = vector.broadcast %7 : vector<1x64xf32> to vector<128x64xf32>
    %9 = arith.addf %6, %8 : vector<128x64xf32>
    %cst_10 = arith.constant 0.000000e+00 : f32
    %10 = vector.broadcast %cst_10 : f32 to vector<128x64xf32>
    %11 = arith.maximumf %9, %10 : vector<128x64xf32>
    %c0_11 = arith.constant 0 : index
    %c0_12 = arith.constant 0 : index
    %12 = vector.load %arg6[%c0_11, %c0_12] : memref<1x64xf32, #tpu.memory_space<vmem>>, vector<1x64xf32>
    %13 = vector.broadcast %12 : vector<1x64xf32> to vector<128x64xf32>
    %14 = arith.mulf %11, %13 : vector<128x64xf32>
    %cst_13 = arith.constant dense<0.000000e+00> : vector<128xf32>
    %15 = vector.multi_reduction <add>, %14, %cst_13 [1] : vector<128x64xf32> to vector<128xf32>
    %c0_14 = arith.constant 0 : index
    %c0_15 = arith.constant 0 : index
    %16 = memref.load %arg7[%c0_14, %c0_15] : memref<1x1xf32, #tpu.memory_space<smem>>
    %17 = vector.broadcast %16 : f32 to vector<128xf32>
    %18 = arith.addf %15, %17 : vector<128xf32>
    %19 = arith.negf %18 : vector<128xf32>
    %20 = math.exp %19 : vector<128xf32>
    %cst_16 = arith.constant 1.000000e+00 : f32
    %21 = vector.broadcast %cst_16 : f32 to vector<128xf32>
    %22 = arith.addf %21, %20 : vector<128xf32>
    %23 = arith.divf %21, %22 : vector<128xf32>
    %24 = vector.shape_cast %23 : vector<128xf32> to vector<1x1x128xf32>
    %c0_17 = arith.constant 0 : index
    %c0_18 = arith.constant 0 : index
    %c0_19 = arith.constant 0 : index
    %25 = vector.load %arg8[%c0_17, %c0_18, %c0_19] : memref<1x1x128xf32, #tpu.memory_space<vmem>>, vector<1x1x128xf32>
    tpu.vector_store %arg8[%c0_17, %c0_18, %c0_19], %24 {strides = array<i32>} : memref<1x1x128xf32, #tpu.memory_space<vmem>>, vector<1x1x128xf32>,
    return
  }
  func.func @transform_0(%arg0: i32) -> (i32, i32) {
    %c0_i32 = arith.constant 0 : i32
    %c0_i32_0 = arith.constant 0 : i32
    return %arg0, %c0_i32 : i32, i32
  }
  func.func @transform_1(%arg0: i32) -> (i32, i32) {
    %c0_i32 = arith.constant 0 : i32
    %c0_i32_0 = arith.constant 0 : i32
    return %arg0, %c0_i32 : i32, i32
  }
  func.func @transform_2(%arg0: i32) -> (i32, i32) {
    %c0_i32 = arith.constant 0 : i32
    %c0_i32_0 = arith.constant 0 : i32
    %c0_i32_1 = arith.constant 0 : i32
    return %c0_i32, %c0_i32_0 : i32, i32
  }
  func.func @transform_3(%arg0: i32) -> (i32, i32) {
    %c0_i32 = arith.constant 0 : i32
    %c0_i32_0 = arith.constant 0 : i32
    %c0_i32_1 = arith.constant 0 : i32
    return %c0_i32, %c0_i32_0 : i32, i32
  }
  func.func @transform_4(%arg0: i32) -> (i32, i32) {
    %c0_i32 = arith.constant 0 : i32
    %c0_i32_0 = arith.constant 0 : i32
    %c0_i32_1 = arith.constant 0 : i32
    return %c0_i32, %c0_i32_0 : i32, i32
  }
  func.func @transform_5(%arg0: i32) -> (i32, i32) {
    %c0_i32 = arith.constant 0 : i32
    %c0_i32_0 = arith.constant 0 : i32
    %c0_i32_1 = arith.constant 0 : i32
    return %c0_i32, %c0_i32_0 : i32, i32
  }
  func.func @transform_6(%arg0: i32) -> (i32, i32) {
    %c0_i32 = arith.constant 0 : i32
    %c0_i32_0 = arith.constant 0 : i32
    %c0_i32_1 = arith.constant 0 : i32
    return %c0_i32, %c0_i32_0 : i32, i32
  }
  func.func @transform_7(%arg0: i32) -> (i32, i32, i32) {
    %c0_i32 = arith.constant 0 : i32
    %c0_i32_0 = arith.constant 0 : i32
    %c0_i32_1 = arith.constant 0 : i32
    return %arg0, %c0_i32, %c0_i32_0 : i32, i32, i32
  }
}

</mosaic_0001>

<bundles_post_ra>
// kernel: recommender_forward.1
= control target key start
LH: loop header
LB: loop body
LE: loop exit
PB: predicated region body
PF: predicated region fallthrough
CT: control target
= control target key end

     0   :  { %vm67_vm0 = vcmask 261120   ;;  %vm350_vm1 = vcmask 523264   ;;  %s1659_s3 = inlined_call_operand.vmem [shape: f32[32,64], index: 3, kind: input, shape index: {}]   ;;  %s1660_s2 = inlined_call_operand.vmem [shape: f32[32,64], index: 2, kind: input, shape index: {}]   ;;  %s1661_s1 = inlined_call_operand.vmem [shape: f32[128,32], index: 1, kind: input, shape index: {}]   ;;  %s1662_s0 = inlined_call_operand.vmem [shape: f32[128,32], index: 0, kind: input, shape index: {}]   ;;  %s1663_s4 = inlined_call_operand.vmem [shape: f32[1,64], index: 4, kind: input, shape index: {}]   ;;  %s1664_s5 = inlined_call_operand.vmem [shape: f32[1,64], index: 5, kind: input, shape index: {}]   ;;  %s1665_s6 = inlined_call_operand.<no memory space> [shape: f32[1,1], index: 6, kind: input, shape index: {}]   ;;  %s1666_s7 = inlined_call_operand.vmem [shape: f32[1,1,128], index: 7, kind: output, shape index: {}]  }
   0x1   :  { %v66_v0 = vld [vmem:[%s1659_s3 + $0x18] sm:$0xff]  ;;  %v65_v2 = vld [vmem:[%s1659_s3 + $0x10] sm:$0xff]  ;;  %v64_v4 = vld [vmem:[%s1659_s3 + $0x8] sm:$0xff] }
   0x2   :  { %v46_v1 = vld [vmem:[%s1660_s2 + $0x18] sm:$0xff]  ;;  %128 = vmatpush.msra.mxu0 %v66_v0  ;;  %854 = vmatpush.msra.mxu2 %v66_v0  ;;  %v45_v3 = vld [vmem:[%s1660_s2 + $0x10] sm:$0xff]  ;;  %v44_v5 = vld [vmem:[%s1660_s2 + $0x8] sm:$0xff] }
   0x3   :  { %241 = vmatpush.msra.mxu1 %v46_v1  ;;  %858 = vmatpush.msra.mxu3 %v46_v1  ;;  %v63_v6 = vld [vmem:[%s1659_s3] sm:$0xff]  ;;  %v48_v12 = vld [vmem:[%s1661_s1 + $0x8] sm:$0xff]  ;;  %v49_v16 = vld [vmem:[%s1661_s1 + $0x10] sm:$0xff] }
   0x4   :  { %129 = vmatpush.msra.mxu0 %v65_v2  ;;  %855 = vmatpush.msra.mxu2 %v65_v2  ;;  %v43_v7 = vld [vmem:[%s1660_s2] sm:$0xff]  ;;  %v56_v13 = vld [vmem:[%s1661_s1 + $0x48] sm:$0xff]  ;;  %v57_v17 = vld [vmem:[%s1661_s1 + $0x50] sm:$0xff] }
   0x5   :  { %242 = vmatpush.msra.mxu1 %v45_v3  ;;  %859 = vmatpush.msra.mxu3 %v45_v3  ;;  %v47_v8 = vld [vmem:[%s1661_s1] sm:$0xff]  ;;  %v28_v14 = vld [vmem:[%s1662_s0 + $0x8] sm:$0xff]  ;;  %v29_v18 = vld [vmem:[%s1662_s0 + $0x10] sm:$0xff] }
   0x6   :  { %130 = vmatpush.msra.mxu0 %v64_v4  ;;  %856 = vmatpush.msra.mxu2 %v64_v4  ;;  %v55_v9 = vld [vmem:[%s1661_s1 + $0x40] sm:$0xff]  ;;  %v36_v15 = vld [vmem:[%s1662_s0 + $0x48] sm:$0xff]  ;;  %v37_v19 = vld [vmem:[%s1662_s0 + $0x50] sm:$0xff] }
   0x7   :  { %243 = vmatpush.msra.mxu1 %v44_v5  ;;  %860 = vmatpush.msra.mxu3 %v44_v5  ;;  %v27_v10 = vld [vmem:[%s1662_s0] sm:$0xff]  ;;  %v50_v20 = vld [vmem:[%s1661_s1 + $0x18] sm:$0xff]  ;;  %v52_v28 = vld [vmem:[%s1661_s1 + $0x28] sm:$0xff] }
   0x8   :  { %131 = vmatpush.msra.mxu0 %v63_v6  ;;  %857 = vmatpush.msra.mxu2 %v63_v6  ;;  %v35_v11 = vld [vmem:[%s1662_s0 + $0x40] sm:$0xff]  ;;  %v58_v21 = vld [vmem:[%s1661_s1 + $0x58] sm:$0xff]  ;;  %v60_v29 = vld [vmem:[%s1661_s1 + $0x68] sm:$0xff] }
   0x9   :  { %244 = vmatpush.msra.mxu1 %v43_v7  ;;  %861 = vmatpush.msra.mxu3 %v43_v7  ;;  %v30_v22 = vld [vmem:[%s1662_s0 + $0x18] sm:$0xff]  ;;  %v51_v24 = vld [vmem:[%s1661_s1 + $0x20] sm:$0xff]  ;;  %v32_v30 = vld [vmem:[%s1662_s0 + $0x28] sm:$0xff] }
   0xa   :  { %806 = vmatmul.msk.f32.vlgmr.msra.gmra.mxu0 %vm67_vm0, %v47_v8  ;;  %814 = vmatmul.msk.f32.vlgmr.msra.gmra.mxu2 %vm67_vm0, %v55_v9  ;;  %v38_v23 = vld [vmem:[%s1662_s0 + $0x58] sm:$0xff]  ;;  %v59_v25 = vld [vmem:[%s1661_s1 + $0x60] sm:$0xff]  ;;  %v40_v31 = vld [vmem:[%s1662_s0 + $0x68] sm:$0xff] }
   0xb   :  { %822 = vmatmul.msk.f32.vlgmr.msra.gmra.mxu1 %vm67_vm0, %v27_v10  ;;  %830 = vmatmul.msk.f32.vlgmr.msra.gmra.mxu3 %vm67_vm0, %v35_v11  ;;  %v31_v26 = vld [vmem:[%s1662_s0 + $0x20] sm:$0xff]  ;;  %v53_v32 = vld [vmem:[%s1661_s1 + $0x30] sm:$0xff]  ;;  %v54_v36 = vld [vmem:[%s1661_s1 + $0x38] sm:$0xff] }
   0xc   :  { %v39_v27 = vld [vmem:[%s1662_s0 + $0x60] sm:$0xff]  ;;  %v61_v33 = vld [vmem:[%s1661_s1 + $0x70] sm:$0xff]  ;;  %v62_v37 = vld [vmem:[%s1661_s1 + $0x78] sm:$0xff] }
   0xd   :  { %v33_v34 = vld [vmem:[%s1662_s0 + $0x30] sm:$0xff]  ;;  %v34_v38 = vld [vmem:[%s1662_s0 + $0x38] sm:$0xff]  ;;  %v1123_v41 = vld [vmem:[%s1663_s4] ss:$0 sm:$0xff] }
   0xe   :  { %v41_v35 = vld [vmem:[%s1662_s0 + $0x70] sm:$0xff]  ;;  %v42_v39 = vld [vmem:[%s1662_s0 + $0x78] sm:$0xff]  ;;  %v1129_v45 = vld [vmem:[%s1664_s5] ss:$0 sm:$0xff] }
  0x12   :  { %807 = vmatmul.msk.f32.gmra.mxu0 %vm67_vm0, %v48_v12  ;;  %815 = vmatmul.msk.f32.gmra.mxu2 %vm67_vm0, %v56_v13 }
  0x13   :  { %823 = vmatmul.msk.f32.gmra.mxu1 %vm67_vm0, %v28_v14  ;;  %831 = vmatmul.msk.f32.gmra.mxu3 %vm67_vm0, %v36_v15 }
  0x1a   :  { %808 = vmatmul.msk.f32.gmra.mxu0 %vm67_vm0, %v49_v16  ;;  %816 = vmatmul.msk.f32.gmra.mxu2 %vm67_vm0, %v57_v17 }
  0x1b   :  { %824 = vmatmul.msk.f32.gmra.mxu1 %vm67_vm0, %v29_v18  ;;  %832 = vmatmul.msk.f32.gmra.mxu3 %vm67_vm0, %v37_v19 }
  0x22   :  { %809 = vmatmul.msk.f32.gmra.mxu0 %vm67_vm0, %v50_v20  ;;  %817 = vmatmul.msk.f32.gmra.mxu2 %vm67_vm0, %v58_v21 }
  0x23   :  { %825 = vmatmul.msk.f32.gmra.mxu1 %vm67_vm0, %v30_v22  ;;  %833 = vmatmul.msk.f32.gmra.mxu3 %vm67_vm0, %v38_v23 }
  0x2a   :  { %810 = vmatmul.msk.f32.gmra.mxu0 %vm67_vm0, %v51_v24  ;;  %818 = vmatmul.msk.f32.gmra.mxu2 %vm67_vm0, %v59_v25 }
  0x2b   :  { %826 = vmatmul.msk.f32.gmra.mxu1 %vm67_vm0, %v31_v26  ;;  %834 = vmatmul.msk.f32.gmra.mxu3 %vm67_vm0, %v39_v27 }
  0x32   :  { %811 = vmatmul.msk.f32.gmra.mxu0 %vm67_vm0, %v52_v28  ;;  %819 = vmatmul.msk.f32.gmra.mxu2 %vm67_vm0, %v60_v29 }
  0x33   :  { %827 = vmatmul.msk.f32.gmra.mxu1 %vm67_vm0, %v32_v30  ;;  %835 = vmatmul.msk.f32.gmra.mxu3 %vm67_vm0, %v40_v31 }
  0x3a   :  { %812 = vmatmul.msk.f32.gmra.mxu0 %vm67_vm0, %v53_v32  ;;  %820 = vmatmul.msk.f32.gmra.mxu2 %vm67_vm0, %v61_v33 }
  0x3b   :  { %828 = vmatmul.msk.f32.gmra.mxu1 %vm67_vm0, %v33_v34  ;;  %836 = vmatmul.msk.f32.gmra.mxu3 %vm67_vm0, %v41_v35 }
  0x42   :  { %813 = vmatmul.msk.f32.gmra.mxu0 %vm67_vm0, %v54_v36  ;;  %821 = vmatmul.msk.f32.gmra.mxu2 %vm67_vm0, %v62_v37 }
  0x43   :  { %829 = vmatmul.msk.f32.gmra.mxu1 %vm67_vm0, %v34_v38  ;;  %837 = vmatmul.msk.f32.gmra.mxu3 %vm67_vm0, %v42_v39 }
  0x87   :  { %v133_v40 = vpop.f32.mrf.mxu0 }
  0x88   :  { %v246_v42 = vpop.f32.mrf.mxu1 }
  0x89   :  { %v247_v43 = vadd.f32 %v246_v42, %v133_v40 }
  0x8b   :  { %v298_v44 = vadd.f32 %v1123_v41, %v247_v43 }
  0x8d   :  { %v314_v46 = vmax.f32 %v298_v44, 0.0  ;;  %v157_v47 = vpop.f32.mrf.mxu2 }
  0x8e   :  { %v270_v48 = vpop.f32.mrf.mxu3 }
  0x8f   :  { %v271_v49 = vadd.f32 %v270_v48, %v157_v47  ;;  %v136_v50 = vpop.f32.mrf.mxu0  ;;  %v334_v51 = vmul.f32 %v1129_v45, %v314_v46 }
  0x90   :  { %v249_v52 = vpop.f32.mrf.mxu1 }
  0x91   :  { %v306_v53 = vadd.f32 %v1123_v41, %v271_v49  ;;  %v250_v54 = vadd.f32 %v249_v52, %v136_v50  ;;  %v351_v55 = vsel %vm350_vm1, %v334_v51, 0.0 }
  0x92   :  { %352 = vadd.xlane.f32.xlu0 %v351_v55 }
  0x93   :  { %v322_v56 = vmax.f32 %v306_v53, 0.0  ;;  %v299_v57 = vadd.f32 %v1123_v41, %v250_v54 }
  0x95   :  { %v315_v58 = vmax.f32 %v299_v57, 0.0  ;;  %v160_v59 = vpop.f32.mrf.mxu2  ;;  %v342_v60 = vmul.f32 %v1129_v45, %v322_v56 }
  0x96   :  { %v273_v61 = vpop.f32.mrf.mxu3 }
  0x97   :  { %v139_v62 = vpop.f32.mrf.mxu0  ;;  %v274_v63 = vadd.f32 %v273_v61, %v160_v59  ;;  %v375_v0 = vsel %vm350_vm1, %v342_v60, 0.0  ;;  %v335_v1 = vmul.f32 %v1129_v45, %v315_v58 }
  0x98   :  { %376 = vadd.xlane.f32.xlu2 %v375_v0  ;;  %v252_v2 = vpop.f32.mrf.mxu1 }
  0x99   :  { %v307_v3 = vadd.f32 %v1123_v41, %v274_v63  ;;  %v253_v4 = vadd.f32 %v252_v2, %v139_v62  ;;  %v354_v5 = vsel %vm350_vm1, %v335_v1, 0.0 }
  0x9a   :  { %355 = vadd.xlane.f32.xlu0 %v354_v5 }
  0x9b   :  { %v323_v6 = vmax.f32 %v307_v3, 0.0  ;;  %v300_v7 = vadd.f32 %v1123_v41, %v253_v4 }
  0x9d   :  { %v316_v8 = vmax.f32 %v300_v7, 0.0  ;;  %v163_v9 = vpop.f32.mrf.mxu2  ;;  %v343_v10 = vmul.f32 %v1129_v45, %v323_v6 }
  0x9e   :  { %v276_v11 = vpop.f32.mrf.mxu3 }
  0x9f   :  { %v142_v12 = vpop.f32.mrf.mxu0  ;;  %v277_v13 = vadd.f32 %v276_v11, %v163_v9  ;;  %v336_v14 = vmul.f32 %v1129_v45, %v316_v8  ;;  %v378_v15 = vsel %vm350_vm1, %v343_v10, 0.0 }
  0xa0   :  { %v255_v16 = vpop.f32.mrf.mxu1 }
  0xa1   :  { %v256_v17 = vadd.f32 %v255_v16, %v142_v12  ;;  %v308_v18 = vadd.f32 %v1123_v41, %v277_v13  ;;  %v357_v19 = vsel %vm350_vm1, %v336_v14, 0.0 }
  0xa2   :  { %358 = vadd.xlane.f32.xlu1 %v357_v19  ;;  %379 = vadd.xlane.f32.xlu0 %v378_v15 }
  0xa3   :  { %v324_v20 = vmax.f32 %v308_v18, 0.0  ;;  %v301_v21 = vadd.f32 %v1123_v41, %v256_v17 }
  0xa5   :  { %v166_v22 = vpop.f32.mrf.mxu2  ;;  %v344_v23 = vmul.f32 %v1129_v45, %v324_v20  ;;  %v317_v28 = vmax.f32 %v301_v21, 0.0 }
  0xa6   :  { %v279_v24 = vpop.f32.mrf.mxu3 }
  0xa7   :  { %v145_v25 = vpop.f32.mrf.mxu0  ;;  %v381_v26 = vsel %vm350_vm1, %v344_v23, 0.0  ;;  %v337_v33 = vmul.f32 %v1129_v45, %v317_v28  ;;  %v280_v38 = vadd.f32 %v279_v24, %v166_v22  ;;  %v1181_v28 = vstv %s1665_s6 }
  0xa8   :  { %v258_v27 = vpop.f32.mrf.mxu1 }
  0xa9   :  { %v259_v29 = vadd.f32 %v258_v27, %v145_v25  ;;  %v360_v42 = vsel %vm350_vm1, %v337_v33, 0.0  ;;  %v309_v44 = vadd.f32 %v1123_v41, %v280_v38 }
  0xaa   :  { %382 = vadd.xlane.f32.xlu1 %v381_v26 }
  0xab   :  { %v302_v30 = vadd.f32 %v1123_v41, %v259_v29  ;;  %v325_v53 = vmax.f32 %v309_v44, 0.0 }
  0xad   :  { %v318_v31 = vmax.f32 %v302_v30, 0.0  ;;  %v169_v32 = vpop.f32.mrf.mxu2  ;;  %v345_v62 = vmul.f32 %v1129_v45, %v325_v53 }
  0xae   :  { %v282_v34 = vpop.f32.mrf.mxu3 }
  0xaf   :  { %v148_v35 = vpop.f32.mrf.mxu0  ;;  %v338_v36 = vmul.f32 %v1129_v45, %v318_v31  ;;  %v283_v57 = vadd.f32 %v282_v34, %v169_v32  ;;  %v384_v9 = vsel %vm350_vm1, %v345_v62, 0.0 }
  0xb0   :  { %v261_v37 = vpop.f32.mrf.mxu1 }
  0xb1   :  { %v262_v39 = vadd.f32 %v261_v37, %v148_v35  ;;  %v363_v40 = vsel %vm350_vm1, %v338_v36, 0.0  ;;  %v310_v0 = vadd.f32 %v1123_v41, %v283_v57 }
  0xb2   :  { %364 = vadd.xlane.f32.xlu2 %v363_v40  ;;  %361 = vadd.xlane.f32.xlu1 %v360_v42 }
  0xb3   :  { %v303_v43 = vadd.f32 %v1123_v41, %v262_v39  ;;  %v326_v11 = vmax.f32 %v310_v0, 0.0 }
  0xb5   :  { %v319_v46 = vmax.f32 %v303_v43, 0.0  ;;  %v172_v47 = vpop.f32.mrf.mxu2  ;;  %v346_v18 = vmul.f32 %v1129_v45, %v326_v11 }
  0xb6   :  { %v285_v48 = vpop.f32.mrf.mxu3 }
  0xb7   :  { %v151_v49 = vpop.f32.mrf.mxu0  ;;  %v286_v50 = vadd.f32 %v285_v48, %v172_v47  ;;  %v339_v51 = vmul.f32 %v1129_v45, %v319_v46  ;;  %v387_v24 = vsel %vm350_vm1, %v346_v18, 0.0 }
  0xb8   :  { %v264_v52 = vpop.f32.mrf.mxu1 }
  0xb9   :  { %v265_v54 = vadd.f32 %v264_v52, %v151_v49  ;;  %v311_v55 = vadd.f32 %v1123_v41, %v286_v50  ;;  %v366_v56 = vsel %vm350_vm1, %v339_v51, 0.0 }
  0xba   :  { %367 = vadd.xlane.f32.xlu2 %v366_v56 }
  0xbb   :  { %v304_v58 = vadd.f32 %v1123_v41, %v265_v54  ;;  %v327_v59 = vmax.f32 %v311_v55, 0.0 }
  0xbd   :  { %v320_v60 = vmax.f32 %v304_v58, 0.0  ;;  %v175_v61 = vpop.f32.mrf.mxu2  ;;  %v347_v63 = vmul.f32 %v1129_v45, %v327_v59 }
  0xbe   :  { %v288_v1 = vpop.f32.mrf.mxu3 }
  0xbf   :  { %v154_v2 = vpop.f32.mrf.mxu0  ;;  %v289_v3 = vadd.f32 %v288_v1, %v175_v61  ;;  %v340_v4 = vmul.f32 %v1129_v45, %v320_v60  ;;  %v390_v5 = vsel %vm350_vm1, %v347_v63, 0.0  ;;  %v737_v63 = vlaneseq }
  0xc0   :  { %v267_v6 = vpop.f32.mrf.mxu1 }
  0xc1   :  { %v268_v7 = vadd.f32 %v267_v6, %v154_v2  ;;  %v312_v8 = vadd.f32 %v1123_v41, %v289_v3  ;;  %v369_v10 = vsel %vm350_vm1, %v340_v4, 0.0 }
  0xc2   :  { %385 = vadd.xlane.f32.xlu2 %v384_v9  ;;  %370 = vadd.xlane.f32.xlu0 %v369_v10 }
  0xc3   :  { %v305_v12 = vadd.f32 %v1123_v41, %v268_v7  ;;  %v328_v13 = vmax.f32 %v312_v8, 0.0 }
  0xc5   :  { %v321_v14 = vmax.f32 %v305_v12, 0.0  ;;  %v178_v15 = vpop.f32.mrf.mxu2  ;;  %v348_v16 = vmul.f32 %v1129_v45, %v328_v13 }
  0xc6   :  { %v291_v17 = vpop.f32.mrf.mxu3 }
  0xc7   :  { %v292_v19 = vadd.f32 %v291_v17, %v178_v15  ;;  %v393_v20 = vsel %vm350_vm1, %v348_v16, 0.0  ;;  %v341_v21 = vmul.f32 %v1129_v45, %v321_v14 }
  0xc9   :  { %v313_v22 = vadd.f32 %v1123_v41, %v292_v19  ;;  %v372_v23 = vsel %vm350_vm1, %v341_v21, 0.0 }
  0xca   :  { %394 = vadd.xlane.f32.xlu2 %v393_v20  ;;  %373 = vadd.xlane.f32.xlu1 %v372_v23 }
  0xcb   :  { %v329_v25 = vmax.f32 %v313_v22, 0.0  ;;  %388 = vadd.xlane.f32.xlu0 %v387_v24 }
  0xcd   :  { %v349_v26 = vmul.f32 %v1129_v45, %v329_v25 }
  0xcf   :  { %v396_v27 = vsel %vm350_vm1, %v349_v26, 0.0  ;;  %vm742_vm1 = vcmask 130112  }
  0xd2   :  { %391 = vadd.xlane.f32.xlu1 %v390_v5  ;;  %v1214_v5 = vand.u32 127, %v737_v63 }
  0xd3   :  { %397 = vadd.xlane.f32.xlu0 %v396_v27 }
  0xd4   :  { %v1228_v15 = vadd.s32 4294967232, %v1214_v5  ;;  %v1231_v16 = vadd.s32 4294967288, %v1214_v5  ;;  %v1234_v17 = vadd.s32 4294967280, %v1214_v5  ;;  %v1245_v24 = vadd.s32 4294967224, %v1214_v5 }
 0x105   :  { %v353_v41 = vpop.xlane.xlu0 %352 }
 0x106   :  { %v401_v29 = vadd.f32 %v1181_v28, %v353_v41 }
 0x108   :  { %v838_v30 = vmul.f32 -1.442695, %v401_v29 }
 0x10a   :  { %864 = vpow2.f32 %v838_v30 }
 0x10b   :  { %v377_v31 = vpop.xlane.xlu2 %376 }
 0x10c   :  { %v409_v33 = vadd.f32 %v1181_v28, %v377_v31 }
 0x10d   :  { %v356_v32 = vpop.xlane.xlu0 %355 }
 0x10e   :  { %v402_v45 = vadd.f32 %v1181_v28, %v356_v32  ;;  %v846_v34 = vmul.f32 -1.442695, %v409_v33 }
 0x110   :  { %v839_v35 = vmul.f32 -1.442695, %v402_v45  ;;  %v865_v36 = vpop.eup %864  ;;  %866 = vpow2.f32 %v846_v34  ;;  %v1261_v45 = vadd.s32 4294967216, %v1214_v5 }
 0x111   :  { %v1188_v42 = vadd.f32 1.0, %v865_v36 }
 0x112   :  { %868 = vpow2.f32 %v839_v35 }
 0x113   :  { %v490_v13 = vand.u32 2147483647, %v1188_v42  ;;  %v492_v14 = vand.u32 2147483648, %v1188_v42  ;;  %vm486_vm2 = vweird.f32 %v1188_v42 }
 0x115   :  { %v359_v37 = vpop.xlane.xlu1 %358  ;;  %v380_v38 = vpop.xlane.xlu0 %379  ;;  %vm1248_vm4 = vcmp.eq.f32.partialorder %v490_v13, 8.507059e+37  ;;  %v493_v27 = vor.u32 1.1754944e-38, %v492_v14 }
 0x116   :  { %v403_v39 = vadd.f32 %v1181_v28, %v359_v37  ;;  %v410_v40 = vadd.f32 %v1181_v28, %v380_v38  ;;  %v867_v46 = vpop.eup %866 }
 0x117   :  { %v1192_v50 = vadd.f32 1.0, %v867_v46 }
 0x118   :  { %v840_v43 = vmul.f32 -1.442695, %v403_v39  ;;  %v847_v44 = vmul.f32 -1.442695, %v410_v40  ;;  %v869_v47 = vpop.eup %868 }
 0x119   :  { %v1194_v51 = vadd.f32 1.0, %v869_v47  ;;  %v612_v41 = vand.u32 2147483648, %v1192_v50  ;;  %v610_v31 = vand.u32 2147483647, %v1192_v50  ;;  %vm606_vm6 = vweird.f32 %v1192_v50 }
 0x11a   :  { %870 = vpow2.f32 %v840_v43 }
 0x11b   :  { %872 = vrcp.f32 %v1188_v42  ;;  %v505_v32 = vand.u32 2147483647, %v1194_v51  ;;  %v507_v33 = vand.u32 2147483648, %v1194_v51  ;;  %v613_v43 = vor.u32 1.1754944e-38, %v612_v41 }
 0x11c   :  { %874 = vpow2.f32 %v847_v44  ;;  %vm501_vm7 = vweird.f32 %v1194_v51  ;;  %v1275_v44 = vadd.s32 4294967264, %v1214_v5  ;;  %vm1285_vm8 = vcmp.eq.f32.partialorder %v610_v31, 8.507059e+37 }
 0x11d   :  { %v383_v48 = vpop.xlane.xlu1 %382  ;;  %876 = vrcp.f32 %v1192_v50  ;;  %vm1289_vm9 = vcmp.eq.f32.partialorder %v505_v32, 8.507059e+37  ;;  %v1365_v32 = vadd.s32 4294967272, %v1214_v5 }
 0x11e   :  { %v411_v49 = vadd.f32 %v1181_v28, %v383_v48  ;;  %878 = vrcp.f32 %v1194_v51 }
 0x120   :  { %v871_v52 = vpop.eup %870  ;;  %v848_v53 = vmul.f32 -1.442695, %v411_v49 }
 0x121   :  { %v1196_v54 = vpop.eup %872  ;;  %v1200_v55 = vadd.f32 1.0, %v871_v52 }
 0x122   :  { %v875_v56 = vpop.eup %874  ;;  %v482_v57 = vmul.f32 %v1196_v54, %v1188_v42  ;;  %880 = vpow2.f32 %v848_v53  ;;  %vm487_vm3 = vweird.f32 %v1196_v54 }
 0x123   :  { %882 = vrcp.f32 %v1200_v55  ;;  %v1206_v61 = vadd.f32 1.0, %v875_v56  ;;  %v1208_v62 = vpop.eup %876  ;;  %vm1253_vm5 = vmor %vm486_vm2, %vm487_vm3  ;;  %vm516_vm12 = vweird.f32 %v1200_v55  ;;  %vm746_vm2 = vcmask 195712  }
 0x124   :  { %v483_v0 = vsub.f32 1.0, %v482_v57  ;;  %v1210_v2 = vpop.eup %878  ;;  %v602_v9 = vmul.f32 %v1208_v62, %v1192_v50  ;;  %vm607_vm10 = vweird.f32 %v1208_v62 }
 0x125   :  { %v365_v58 = vpop.xlane.xlu2 %364  ;;  %v362_v60 = vpop.xlane.xlu1 %361  ;;  %884 = vrcp.f32 %v1206_v61  ;;  %v497_v10 = vmul.f32 %v1210_v2, %v1194_v51  ;;  %vm502_vm11 = vweird.f32 %v1210_v2  ;;  %vm1309_vm13 = vmor %vm606_vm6, %vm607_vm10  ;;  %vm621_vm0 = vweird.f32 %v1206_v61 }
 0x126   :  { %v405_v59 = vadd.f32 %v1181_v28, %v365_v58  ;;  %v404_v3 = vadd.f32 %v1181_v28, %v362_v60  ;;  %v484_v6 = vmul.f32 %v1196_v54, %v483_v0  ;;  %v603_v22 = vsub.f32 1.0, %v602_v9  ;;  %vm1321_vm14 = vmor %vm501_vm7, %vm502_vm11 }
 0x127   :  { %v498_v23 = vsub.f32 1.0, %v497_v10 }
 0x128   :  { %v842_v1 = vmul.f32 -1.442695, %v405_v59  ;;  %v881_v4 = vpop.eup %880  ;;  %v841_v12 = vmul.f32 -1.442695, %v404_v3  ;;  %v485_v19 = vadd.f32 %v1196_v54, %v484_v6  ;;  %v604_v39 = vmul.f32 %v1208_v62, %v603_v22 }
 0x129   :  { %v1217_v8 = vpop.eup %882  ;;  %v1223_v11 = vadd.f32 1.0, %v881_v4  ;;  %v499_v40 = vmul.f32 %v1210_v2, %v498_v23  ;;  %v520_v6 = vand.u32 2147483647, %v1200_v55  ;;  %v625_v22 = vand.u32 2147483647, %v1206_v61 }
 0x12a   :  { %886 = vpow2.f32 %v842_v1  ;;  %v512_v20 = vmul.f32 %v1217_v8, %v1200_v55  ;;  %v489_v34 = vsel %vm1253_vm5, %v1196_v54, %v485_v19  ;;  %v508_v54 = vor.u32 1.1754944e-38, %v507_v33 }
 0x12b   :  { %888 = vpow2.f32 %v841_v12  ;;  %v1242_v21 = vpop.eup %884  ;;  %v1283_v49 = vsel %vm1248_vm4, %v493_v27, %v489_v34  ;;  %v605_v58 = vadd.f32 %v1208_v62, %v604_v39  ;;  %v500_v59 = vadd.f32 %v1210_v2, %v499_v40 }
 0x12c   :  { %890 = vrcp.f32 %v1223_v11  ;;  %v513_v35 = vsub.f32 1.0, %v512_v20  ;;  %v617_v42 = vmul.f32 %v1242_v21, %v1206_v61  ;;  %v739_v0 = vperm.slane %v1283_v49, %v1214_v5 }
 0x12d   :  { %v368_v7 = vpop.xlane.xlu2 %367  ;;  %vm517_vm15 = vweird.f32 %v1217_v8  ;;  %v504_v51 = vsel %vm1321_vm14, %v1210_v2, %v500_v59  ;;  %vm1350_vm4 = vcmp.eq.f32.partialorder %v520_v6, 8.507059e+37  ;;  %vm622_vm5 = vweird.f32 %v1242_v21 }
 0x12e   :  { %v406_v18 = vadd.f32 %v1181_v28, %v368_v7  ;;  %v514_v57 = vmul.f32 %v1217_v8, %v513_v35  ;;  %v618_v60 = vsub.f32 1.0, %v617_v42  ;;  %v522_v7 = vand.u32 2147483648, %v1200_v55  ;;  %vm1346_vm3 = vmor %vm516_vm12, %vm517_vm15 }
 0x12f   :  { %v509_v31 = vsel %vm1289_vm9, %v508_v54, %v504_v51  ;;  %vm1370_vm6 = vcmp.eq.f32.partialorder %v625_v22, 8.507059e+37  ;;  %vm1391_vm7 = vmor %vm621_vm0, %vm622_vm5  ;;  %v640_v59 = vand.u32 2147483647, %v1223_v11 }
 0x130   :  { %v887_v25 = vpop.eup %886  ;;  %v843_v29 = vmul.f32 -1.442695, %v406_v18  ;;  %v515_v50 = vadd.f32 %v1217_v8, %v514_v57  ;;  %v609_v18 = vsel %vm1309_vm13, %v1208_v62, %v605_v58  ;;  %v619_v19 = vmul.f32 %v1242_v21, %v618_v60 }
 0x131   :  { %v1266_v36 = vadd.f32 1.0, %v887_v25  ;;  %v889_v38 = vpop.eup %888  ;;  %v523_v41 = vor.u32 1.1754944e-38, %v522_v7  ;;  %v1357_v30 = vsel %vm1285_vm8, %v613_v43, %v609_v18  ;;  %v741_v57 = vperm.slane %v509_v31, %v1231_v16 }
 0x132   :  { %892 = vpow2.f32 %v843_v29  ;;  %v1277_v46 = vadd.f32 1.0, %v889_v38  ;;  %v1279_v48 = vpop.eup %890  ;;  %v627_v29 = vand.u32 2147483648, %v1206_v61  ;;  %v519_v55 = vsel %vm1346_vm3, %v1217_v8, %v515_v50 }
 0x133   :  { %894 = vrcp.f32 %v1266_v36  ;;  %v632_v1 = vmul.f32 %v1279_v48, %v1223_v11  ;;  %v620_v34 = vadd.f32 %v1242_v21, %v619_v19  ;;  %v524_v43 = vsel %vm1350_vm4, %v523_v41, %v519_v55 }
 0x134   :  { %896 = vrcp.f32 %v1277_v46  ;;  %vm636_vm8 = vweird.f32 %v1223_v11  ;;  %vm637_vm9 = vweird.f32 %v1279_v48  ;;  %v642_v16 = vand.u32 2147483648, %v1223_v11 }
 0x135   :  { %v386_v37 = vpop.xlane.xlu2 %385  ;;  %v371_v47 = vpop.xlane.xlu0 %370  ;;  %v633_v23 = vsub.f32 1.0, %v632_v1  ;;  %v745_v61 = vperm.slane %v524_v43, %v1234_v17  ;;  %vm1416_vm10 = vcmp.eq.f32.partialorder %v640_v59, 8.507059e+37  ;;  %vm1426_vm11 = vmor %vm636_vm8, %vm637_vm9  ;;  %v1443_v19 = vadd.s32 4294967208, %v1214_v5 }
 0x136   :  { %v412_v56 = vadd.f32 %v1181_v28, %v386_v37  ;;  %v407_v3 = vadd.f32 %v1181_v28, %v371_v47  ;;  %v628_v47 = vor.u32 1.1754944e-38, %v627_v29  ;;  %v643_v49 = vor.u32 1.1754944e-38, %v642_v16 }
 0x137   :  { %v634_v39 = vmul.f32 %v1279_v48, %v633_v23  ;;  %vm546_vm12 = vweird.f32 %v1266_v36  ;;  %v552_v62 = vand.u32 2147483648, %v1266_v36  ;;  %v535_v55 = vand.u32 2147483647, %v1277_v46 }
 0x138   :  { %v893_v63 = vpop.eup %892  ;;  %v849_v10 = vmul.f32 -1.442695, %v412_v56  ;;  %v844_v13 = vmul.f32 -1.442695, %v407_v3  ;;  %v769_v56 = vperm.slane %v1357_v30, %v1228_v15  ;;  %vm531_vm0 = vweird.f32 %v1277_v46 }
 0x139   :  { %v1315_v9 = vadd.f32 1.0, %v893_v63  ;;  %v1336_v20 = vpop.eup %894  ;;  %v624_v63 = vsel %vm1391_vm7, %v1242_v21, %v620_v34  ;;  %v635_v1 = vadd.f32 %v1279_v48, %v634_v39  ;;  %v743_v21 = vsel %vm742_vm1, %v741_v57, %v739_v0 }
 0x13a   :  { %v1340_v27 = vpop.eup %896  ;;  %v542_v8 = vmul.f32 %v1336_v20, %v1266_v36  ;;  %v1414_v12 = vsel %vm1370_vm6, %v628_v47, %v624_v63  ;;  %v550_v0 = vand.u32 2147483647, %v1266_v36  ;;  %v1436_v18 = vsel %vm746_vm2, %v745_v61, %v743_v21 }
 0x13b   :  { %898 = vrcp.f32 %v1315_v9  ;;  %v527_v40 = vmul.f32 %v1340_v27, %v1277_v46  ;;  %v639_v51 = vsel %vm1426_vm11, %v1279_v48, %v635_v1  ;;  %v773_v23 = vperm.slane %v1414_v12, %v1245_v24 }
 0x13c   :  { %900 = vpow2.f32 %v844_v13  ;;  %v543_v3 = vsub.f32 1.0, %v542_v8  ;;  %v1452_v48 = vadd.s32 4294967248, %v1214_v5  ;;  %v1456_v29 = vsel %vm1416_vm10, %v643_v49, %v639_v51 }
 0x13d   :  { %v395_v14 = vpop.xlane.xlu2 %394  ;;  %v374_v26 = vpop.xlane.xlu1 %373  ;;  %902 = vpow2.f32 %v849_v10  ;;  %v528_v4 = vsub.f32 1.0, %v527_v40  ;;  %vm1458_vm13 = vcmp.eq.f32.partialorder %v550_v0, 8.507059e+37  ;;  %vm547_vm14 = vweird.f32 %v1336_v20 }
 0x13e   :  { %v415_v25 = vadd.f32 %v1181_v28, %v395_v14  ;;  %v389_v33 = vpop.xlane.xlu0 %388  ;;  %v408_v37 = vadd.f32 %v1181_v28, %v374_v26  ;;  %v1432_v14 = vadd.s32 4294967256, %v1214_v5  ;;  %v544_v11 = vmul.f32 %v1336_v20, %v543_v3  ;;  %vm1483_vm1 = vmor %vm546_vm12, %vm547_vm14 }
 0x13f   :  { %v413_v53 = vadd.f32 %v1181_v28, %v389_v33  ;;  %v537_v33 = vand.u32 2147483648, %v1277_v46  ;;  %vm532_vm15 = vweird.f32 %v1340_v27  ;;  %v777_v43 = vperm.slane %v1456_v29, %v1261_v45 }
 0x140   :  { %v852_v35 = vmul.f32 -1.442695, %v415_v25  ;;  %v845_v52 = vmul.f32 -1.442695, %v408_v37  ;;  %v529_v25 = vmul.f32 %v1340_v27, %v528_v4  ;;  %v545_v34 = vadd.f32 %v1336_v20, %v544_v11  ;;  %vm1500_vm4 = vmor %vm531_vm0, %vm532_vm15 }
 0x141   :  { %v1379_v42 = vpop.eup %898  ;;  %v850_v10 = vmul.f32 -1.442695, %v413_v53  ;;  %v553_v47 = vor.u32 1.1754944e-38, %v552_v62  ;;  %vm1487_vm2 = vcmp.eq.f32.partialorder %v535_v55, 8.507059e+37  ;;  %v538_v58 = vor.u32 1.1754944e-38, %v537_v33 }
 0x142   :  { %v901_v54 = vpop.eup %900  ;;  %904 = vpow2.f32 %v852_v35  ;;  %v557_v6 = vmul.f32 %v1379_v42, %v1315_v9  ;;  %v530_v38 = vadd.f32 %v1340_v27, %v529_v25  ;;  %v565_v59 = vand.u32 2147483647, %v1315_v9 }
 0x143   :  { %v903_v60 = vpop.eup %902  ;;  %v1406_v7 = vadd.f32 1.0, %v901_v54  ;;  %906 = vpow2.f32 %v845_v52  ;;  %vm750_vm3 = vcmask 261312   ;;  %vm562_vm5 = vweird.f32 %v1379_v42 }
 0x144   :  { %v1420_v50 = vadd.f32 1.0, %v903_v60  ;;  %v558_v26 = vsub.f32 1.0, %v557_v6  ;;  %v549_v60 = vsel %vm1483_vm1, %v1336_v20, %v545_v34  ;;  %v534_v16 = vsel %vm1500_vm4, %v1340_v27, %v530_v38 }
 0x145   :  { %908 = vrcp.f32 %v1406_v7  ;;  %v392_v2 = vpop.xlane.xlu1 %391  ;;  %vm561_vm6 = vweird.f32 %v1315_v9  ;;  %v567_v3 = vand.u32 2147483648, %v1315_v9  ;;  %v1516_v6 = vadd.s32 4294967184, %v1214_v5 }
 0x146   :  { %910 = vpow2.f32 %v850_v10  ;;  %v559_v39 = vmul.f32 %v1379_v42, %v558_v26  ;;  %v414_v40 = vadd.f32 %v1181_v28, %v392_v2  ;;  %v554_v10 = vsel %vm1458_vm13, %v553_v47, %v549_v60  ;;  %vm1528_vm9 = vmor %vm561_vm6, %vm562_vm5  ;;  %v398_v0 = vpop.xlane.xlu0 %397 }
 0x147   :  { %912 = vrcp.f32 %v1420_v50  ;;  %v539_v21 = vsel %vm1487_vm2, %v538_v58, %v534_v16  ;;  %vm754_vm8 = vcmask 326912   ;;  %v580_v13 = vand.u32 2147483647, %v1406_v7 }
 0x148   :  { %v905_v22 = vpop.eup %904  ;;  %v560_v61 = vadd.f32 %v1379_v42, %v559_v39  ;;  %v851_v20 = vmul.f32 -1.442695, %v414_v40  ;;  %v582_v49 = vand.u32 2147483648, %v1406_v7  ;;  %vm758_vm10 = vcmask 392512  }
 0x149   :  { %v907_v41 = vpop.eup %906  ;;  %v1467_v35 = vadd.f32 1.0, %v905_v22  ;;  %vm566_vm11 = vcmp.eq.f32.partialorder %v565_v59, 8.507059e+37  ;;  %vm576_vm12 = vweird.f32 %v1406_v7  ;;  %v753_v25 = vperm.slane %v554_v10, %v1275_v44 }
 0x14a   :  { %v1473_v8 = vadd.f32 1.0, %v907_v41  ;;  %v564_v11 = vsel %vm1528_vm9, %v1379_v42, %v560_v61  ;;  %v568_v26 = vor.u32 1.1754944e-38, %v567_v3  ;;  %vm762_vm13 = vcmask 458112  }
 0x14b   :  { %v1469_v37 = vpop.eup %908  ;;  %v764_v2 = vadd.s32 4294967240, %v1214_v5  ;;  %v749_v41 = vperm.slane %v539_v21, %v1365_v32  ;;  %vm766_vm15 = vcmask 523712   ;;  %v416_v44 = vadd.f32 %v1181_v28, %v398_v0 }
 0x14c   :  { %v572_v52 = vmul.f32 %v1469_v37, %v1406_v7  ;;  %v911_v53 = vpop.eup %910  ;;  %914 = vrcp.f32 %v1473_v8  ;;  %vm577_vm7 = vweird.f32 %v1469_v37  ;;  %v569_v55 = vsel %vm566_vm11, %v568_v26, %v564_v11 }
 0x14d   :  { %v1493_v46 = vpop.eup %912  ;;  %916 = vrcp.f32 %v1467_v35  ;;  %v1510_v1 = vadd.f32 1.0, %v911_v53  ;;  %vm1544_vm14 = vmor %vm576_vm12, %vm577_vm7  ;;  %vm581_vm0 = vcmp.eq.f32.partialorder %v580_v13, 8.507059e+37  ;;  %v583_v33 = vor.u32 1.1754944e-38, %v582_v49 }
 0x14e   :  { %v573_v63 = vsub.f32 1.0, %v572_v52  ;;  %v647_v27 = vmul.f32 %v1493_v46, %v1420_v50  ;;  %v595_v40 = vand.u32 2147483647, %v1473_v8  ;;  %v597_v32 = vand.u32 2147483648, %v1473_v8 }
 0x14f   :  { %918 = vrcp.f32 %v1510_v1  ;;  %v853_v47 = vmul.f32 -1.442695, %v416_v44  ;;  %v751_v54 = vsel %vm750_vm3, %v749_v41, %v1436_v18  ;;  %v757_v57 = vperm.slane %v569_v55, %v1432_v14 }
 0x150   :  { %v574_v4 = vmul.f32 %v1469_v37, %v573_v63  ;;  %920 = vpow2.f32 %v851_v20  ;;  %v648_v7 = vsub.f32 1.0, %v647_v27  ;;  %vm591_vm2 = vweird.f32 %v1473_v8 }
 0x151   :  { %922 = vpow2.f32 %v853_v47  ;;  %v655_v63 = vand.u32 2147483647, %v1420_v50  ;;  %v657_v16 = vand.u32 2147483648, %v1420_v50  ;;  %v598_v20 = vor.u32 1.1754944e-38, %v597_v32 }
 0x152   :  { %v575_v17 = vadd.f32 %v1469_v37, %v574_v4  ;;  %v915_v51 = vpop.eup %914  ;;  %v649_v58 = vmul.f32 %v1493_v46, %v648_v7  ;;  %vm596_vm3 = vcmp.eq.f32.partialorder %v595_v40, 8.507059e+37  ;;  %v755_v14 = vsel %vm754_vm8, %v753_v25, %v751_v54 }
 0x153   :  { %v1539_v22 = vpop.eup %916  ;;  %v587_v42 = vmul.f32 %v915_v51, %v1473_v8  ;;  %vm592_vm1 = vweird.f32 %v915_v51  ;;  %vm652_vm5 = vweird.f32 %v1493_v46  ;;  %v759_v10 = vsel %vm758_vm10, %v757_v57, %v755_v14 }
 0x154   :  { %v579_v31 = vsel %vm1544_vm14, %v1469_v37, %v575_v17  ;;  %v692_v39 = vmul.f32 %v1539_v22, %v1467_v35  ;;  %vm593_vm4 = vmor %vm591_vm2, %vm592_vm1  ;;  %v650_v8 = vadd.f32 %v1493_v46, %v649_v58  ;;  %vm770_vm6 = vcmask 589312  }
 0x155   :  { %v588_v34 = vsub.f32 1.0, %v587_v42  ;;  %v1555_v38 = vpop.eup %918  ;;  %v584_v52 = vsel %vm581_vm0, %v583_v33, %v579_v31  ;;  %vm651_vm7 = vweird.f32 %v1420_v50  ;;  %vm774_vm9 = vcmask 654912  }
 0x156   :  { %v662_v28 = vmul.f32 %v1555_v38, %v1510_v1  ;;  %v921_v37 = vpop.eup %920  ;;  %v761_v61 = vperm.slane %v584_v52, %v1452_v48  ;;  %v693_v18 = vsub.f32 1.0, %v692_v39  ;;  %v1582_v17 = vadd.s32 4294967200, %v1214_v5  ;;  %vm1584_vm8 = vmor %vm651_vm7, %vm652_vm5 }
 0x157   :  { %v589_v53 = vmul.f32 %v915_v51, %v588_v34  ;;  %v1568_v36 = vadd.f32 1.0, %v921_v37  ;;  %v923_v21 = vpop.eup %922  ;;  %vm778_vm10 = vcmask 720512   ;;  %v654_v50 = vsel %vm1584_vm8, %v1493_v46, %v650_v8 }
 0x158   :  { %v663_v60 = vsub.f32 1.0, %v662_v28  ;;  %v763_v9 = vsel %vm762_vm13, %v761_v61, %v759_v10  ;;  %v694_v49 = vmul.f32 %v1539_v22, %v693_v18  ;;  %vm1595_vm11 = vcmp.eq.f32.partialorder %v655_v63, 8.507059e+37 }
 0x159   :  { %v590_v59 = vadd.f32 %v915_v51, %v589_v53  ;;  %924 = vrcp.f32 %v1568_v36  ;;  %v658_v25 = vor.u32 1.1754944e-38, %v657_v16  ;;  %vm782_vm12 = vcmask 786112  }
 0x15a   :  { %v664_v48 = vmul.f32 %v1555_v38, %v663_v60  ;;  %vm667_vm13 = vweird.f32 %v1555_v38  ;;  %vm696_vm14 = vweird.f32 %v1467_v35  ;;  %v672_v46 = vand.u32 2147483648, %v1510_v1 }
 0x15b   :  { %v594_v3 = vsel %vm593_vm4, %v915_v51, %v590_v59  ;;  %v1590_v51 = vadd.f32 1.0, %v923_v21  ;;  %v695_v41 = vadd.f32 %v1539_v22, %v694_v49  ;;  %vm697_vm0 = vweird.f32 %v1539_v22 }
 0x15c   :  { %v599_v4 = vsel %vm596_vm3, %v598_v20, %v594_v3  ;;  %vm666_vm1 = vweird.f32 %v1510_v1  ;;  %v670_v15 = vand.u32 2147483647, %v1510_v1  ;;  %v659_v30 = vsel %vm1595_vm11, %v658_v25, %v654_v50  ;;  %vm1632_vm4 = vmor %vm696_vm14, %vm697_vm0 }
 0x15d   :  { %v765_v27 = vperm.slane %v599_v4, %v764_v2  ;;  %v665_v2 = vadd.f32 %v1555_v38, %v664_v48  ;;  %926 = vrcp.f32 %v1590_v51  ;;  %vm1620_vm2 = vmor %vm666_vm1, %vm667_vm13  ;;  %v702_v55 = vand.u32 2147483648, %v1467_v35 }
 0x15e   :  { %v788_v33 = vadd.s32 4294967192, %v1214_v5  ;;  %v687_v34 = vand.u32 2147483648, %v1568_v36  ;;  %v673_v12 = vor.u32 1.1754944e-38, %v672_v46  ;;  %v685_v39 = vand.u32 2147483647, %v1568_v36 }
 0x15f   :  { %v767_v0 = vsel %vm766_vm15, %v765_v27, %v763_v9  ;;  %v925_v26 = vpop.eup %924  ;;  %vm786_vm15 = vcmask 851712   ;;  %v669_v1 = vsel %vm1620_vm2, %v1555_v38, %v665_v2  ;;  %v781_v32 = vperm.slane %v659_v30, %v1443_v19 }
 0x160   :  { %v771_v62 = vsel %vm770_vm6, %v769_v56, %v767_v0  ;;  %v677_v42 = vmul.f32 %v925_v26, %v1568_v36  ;;  %v700_v56 = vand.u32 2147483647, %v1467_v35  ;;  %vm682_vm3 = vweird.f32 %v925_v26 }
 0x161   :  { %v775_v7 = vsel %vm774_vm9, %v773_v23, %v771_v62  ;;  %v699_v38 = vsel %vm1632_vm4, %v1539_v22, %v695_v41  ;;  %vm671_vm5 = vcmp.eq.f32.partialorder %v670_v15, 8.507059e+37  ;;  %vm681_vm6 = vweird.f32 %v1568_v36 }
 0x162   :  { %v678_v44 = vsub.f32 1.0, %v677_v42  ;;  %v779_v35 = vsel %vm778_vm10, %v777_v43, %v775_v7  ;;  %v674_v47 = vsel %vm671_vm5, %v673_v12, %v669_v1  ;;  %vm701_vm7 = vcmp.eq.f32.partialorder %v700_v56, 8.507059e+37  ;;  %vm683_vm8 = vmor %vm681_vm6, %vm682_vm3 }
 0x163   :  { %v927_v40 = vpop.eup %926  ;;  %v703_v28 = vor.u32 1.1754944e-38, %v702_v55  ;;  %vm790_vm9 = vcmask 917312   ;;  %v688_v19 = vor.u32 1.1754944e-38, %v687_v34  ;;  %v783_v37 = vsel %vm782_vm12, %v781_v32, %v779_v35 }
 0x164   :  { %v679_v23 = vmul.f32 %v925_v26, %v678_v44  ;;  %v707_v53 = vmul.f32 %v927_v40, %v1590_v51  ;;  %vm686_vm11 = vcmp.eq.f32.partialorder %v685_v39, 8.507059e+37  ;;  %v785_v29 = vperm.slane %v674_v47, %v1582_v17 }
 0x165   :  { %v704_v45 = vsel %vm701_vm7, %v703_v28, %v699_v38  ;;  %v717_v57 = vand.u32 2147483648, %v1590_v51  ;;  %vm712_vm10 = vweird.f32 %v927_v40  ;;  %v715_v60 = vand.u32 2147483647, %v1590_v51 }
 0x166   :  { %v680_v52 = vadd.f32 %v925_v26, %v679_v23  ;;  %v708_v54 = vsub.f32 1.0, %v707_v53  ;;  %v787_v36 = vsel %vm786_vm15, %v785_v29, %v783_v37  ;;  %vm794_vm13 = vcmask 982912  }
 0x167   :  { %v796_v16 = vadd.s32 4294967176, %v1214_v5  ;;  %vm711_vm12 = vweird.f32 %v1590_v51  ;;  %v793_v20 = vperm.slane %v704_v45, %v1516_v6  ;;  %v718_v18 = vor.u32 1.1754944e-38, %v717_v57 }
 0x168   :  { %v684_v22 = vsel %vm683_vm8, %v925_v26, %v680_v52  ;;  %v709_v59 = vmul.f32 %v927_v40, %v708_v54  ;;  %vm713_vm14 = vmor %vm711_vm12, %vm712_vm10  ;;  %vm716_vm0 = vcmp.eq.f32.partialorder %v715_v60, 8.507059e+37  ;;  %vm798_vm1 = vcmask 1048512  }
 0x169   :  { %v689_v43 = vsel %vm686_vm11, %v688_v19, %v684_v22 }
 0x16a   :  { %v789_v58 = vperm.slane %v689_v43, %v788_v33  ;;  %v710_v61 = vadd.f32 %v927_v40, %v709_v59 }
 0x16c   :  { %v791_v63 = vsel %vm790_vm9, %v789_v58, %v787_v36  ;;  %v714_v3 = vsel %vm713_vm14, %v927_v40, %v710_v61 }
 0x16d   :  { %v795_v14 = vsel %vm794_vm13, %v793_v20, %v791_v63  ;;  %v719_v8 = vsel %vm716_vm0, %v718_v18, %v714_v3 }
 0x16e   :  { %v797_v4 = vperm.slane %v719_v8, %v796_v16 }
 0x170   :  { %v799_v10 = vsel %vm798_vm1, %v797_v4, %v795_v14 }
 0x171   :  { %801 = vst [vmem:[%s1666_s7] sm:$0x1] %v799_v10 }

</bundles_post_ra>
